<compile_context>
chip_gen: v7x
topology: tpu7x:2x2x1
jax: 0.10.0
libtpu: 0.0.40
codegen_flags: <defaults>
</compile_context>

<pallas_src>
import functools

import jax
import jax.numpy as jnp
from jax.experimental import pallas as pl
from jax.experimental.pallas import tpu as pltpu


def _round_up(x: int, m: int) -> int:
    return ((x + m - 1) // m) * m


def _mlp_kernel(x_ref, w1_ref, b1_ref, w2_ref, b2_ref, w3_ref, b3_ref, o_ref):
    # x arrives at true width (tile, num_i) in f32; cast to bf16 in VMEM.
    x = x_ref[...].astype(w1_ref.dtype)
    # Layer 1: bf16 matmul on MXU (small K handled by Mosaic), f32 accumulate.
    h1 = jnp.dot(x, w1_ref[...], preferred_element_type=jnp.float32)
    h1 = jnp.maximum(h1 + b1_ref[...], 0.0)
    # Layer 2.
    h2 = jnp.dot(h1.astype(w2_ref.dtype), w2_ref[...],
                 preferred_element_type=jnp.float32)
    h2 = jnp.maximum(h2 + b2_ref[...], 0.0)
    # Layer 3 (no activation); store at true output width.
    h3 = jnp.dot(h2.astype(w3_ref.dtype), w3_ref[...],
                 preferred_element_type=jnp.float32)
    o_ref[...] = (h3 + b3_ref[...]).astype(o_ref.dtype)


def prepare_mlp_params(w1, b1, w2, b2, w3, b3, compute_dtype=jnp.bfloat16):
    """One-time padding/casting of the (static) weights.

    Weights are (in, out); biases are (1, out). Only the hidden dim is padded to a
    128-lane multiple; the input (K of layer 1) and output dims stay at true width.
    """
    num_i, num_h = w1.shape
    num_o = w3.shape[1]
    ph = _round_up(num_h, 128)

    w1p = jnp.pad(w1, ((0, 0), (0, ph - num_h))).astype(compute_dtype)   # (num_i, ph)
    b1p = jnp.pad(b1, ((0, 0), (0, ph - num_h))).astype(jnp.float32)     # (1, ph)
    w2p = jnp.pad(w2, ((0, ph - num_h), (0, ph - num_h))).astype(compute_dtype)
    b2p = jnp.pad(b2, ((0, 0), (0, ph - num_h))).astype(jnp.float32)     # (1, ph)
    w3p = jnp.pad(w3, ((0, ph - num_h), (0, 0))).astype(compute_dtype)   # (ph, num_o)
    b3p = b3.astype(jnp.float32)                                         # (1, num_o)
    return (w1p, b1p, w2p, b2p, w3p, b3p)


@functools.partial(jax.jit, static_argnames=("tile_n",))
def mlp_forward(x, params, *, tile_n: int = 1024):
    """x: (N, num_i) f32. params from prepare_mlp_params. Returns (N, num_o) f32."""
    w1p, b1p, w2p, b2p, w3p, b3p = params
    n, num_i = x.shape
    ph = w1p.shape[1]
    num_o = w3p.shape[1]

    # Sublane-aligned batch tile (16 is safe for bf16 packing and f32 blocks).
    sublane = 16
    eff_tile = max(sublane, min(_round_up(tile_n, sublane), _round_up(n, sublane)))
    # v7x: if the grid would have a single step but the batch permits, split into
    # >=2 tiles so the "parallel" axis shards across both TensorCores.
    if _round_up(n, eff_tile) // eff_tile < 2 <= _round_up(n, sublane) // sublane:
        eff_tile = _round_up((n + 1) // 2, sublane)
    pn = _round_up(n, eff_tile)

    # Only pad rows (true width kept); skip entirely when already aligned.
    xp = x if pn == n else jnp.pad(x, ((0, pn - n), (0, 0)))

    grid = (pn // eff_tile,)

    out = pl.pallas_call(
        _mlp_kernel,
        out_shape=jax.ShapeDtypeStruct((pn, num_o), jnp.float32),
        grid=grid,
        in_specs=[
            # x: tiled along the batch axis, true feature width (last dim == full dim).
            pl.BlockSpec((eff_tile, num_i), lambda i: (i, 0)),
            # Weights / biases: constant index_map -> DMA'd once, VMEM-resident.
            pl.BlockSpec((num_i, ph), lambda i: (0, 0)),
            pl.BlockSpec((1, ph), lambda i: (0, 0)),
            pl.BlockSpec((ph, ph), lambda i: (0, 0)),
            pl.BlockSpec((1, ph), lambda i: (0, 0)),
            pl.BlockSpec((ph, num_o), lambda i: (0, 0)),
            pl.BlockSpec((1, num_o), lambda i: (0, 0)),
        ],
        # Output at true width (last dim == full dim) -> minimal HBM write stream.
        out_specs=pl.BlockSpec((eff_tile, num_o), lambda i: (i, 0)),
        compiler_params=pltpu.CompilerParams(
            dimension_semantics=("parallel",),   # megacore sharding on v7x
        ),
    )(xp, w1p, b1p, w2p, b2p, w3p, b3p)

    # Row slice only if the batch was padded; no column slice needed.
    return out if pn == n else out[:n]


def init_linear_params(key, fan_in, fan_out):
    """Deterministic PyTorch-style Linear init: U(-1/sqrt(fan_in), 1/sqrt(fan_in))."""
    kw, kb = jax.random.split(key)
    bound = 1.0 / jnp.sqrt(jnp.float32(fan_in))
    # stored as (in, out), i.e. already transposed relative to torch's (out, in)
    w = jax.random.uniform(kw, (fan_in, fan_out), jnp.float32, -bound, bound)
    b = jax.random.uniform(kb, (1, fan_out), jnp.float32, -bound, bound)
    return w, b


def _ref_forward(x, w1, b1, w2, b2, w3, b3):
    """Pure-JAX reference with the same bf16-input / f32-accumulate numerics."""
    bf = lambda a: a.astype(jnp.bfloat16).astype(jnp.float32)
    hp = jax.lax.Precision.HIGHEST
    h = jnp.maximum(jnp.dot(bf(x), bf(w1), precision=hp) + b1, 0.0)
    h = jnp.maximum(jnp.dot(bf(h), bf(w2), precision=hp) + b2, 0.0)
    return jnp.dot(bf(h), bf(w3), precision=hp) + b3


if __name__ == "__main__":
    num_i, num_h, num_o = 5, 100, 10
    batch = 8

    key = jax.random.PRNGKey(0)
    kx, k1, k2, k3 = jax.random.split(key, 4)

    x = jax.random.normal(kx, (batch, num_i), jnp.float32)
    w1, b1 = init_linear_params(k1, num_i, num_h)
    w2, b2 = init_linear_params(k2, num_h, num_h)
    w3, b3 = init_linear_params(k3, num_h, num_o)

    # Weight padding / bf16 cast is hoisted out of the forward path (paid once).
    params = prepare_mlp_params(w1, b1, w2, b2, w3, b3)

    out = mlp_forward(x, params)
    out = jax.block_until_ready(out)

    ref = _ref_forward(x, w1, b1, w2, b2, w3, b3)
    assert out.shape == (batch, num_o)
    assert jnp.allclose(out, ref, atol=2e-3, rtol=2e-3), \
        f"max abs err = {jnp.max(jnp.abs(out - ref))}"

    print("KERNEL_OK")
</pallas_src>

<mosaic_0001>
module attributes {stable_mosaic.version = 11 : i64} {
  func.func @_mlp_kernel(%arg0: i32, %arg1: memref<16x5xf32, #tpu.memory_space<vmem>>, %arg2: memref<5x128xbf16, #tpu.memory_space<vmem>>, %arg3: memref<1x128xf32, #tpu.memory_space<vmem>>, %arg4: memref<128x128xbf16, #tpu.memory_space<vmem>>, %arg5: memref<1x128xf32, #tpu.memory_space<vmem>>, %arg6: memref<128x10xbf16, #tpu.memory_space<vmem>>, %arg7: memref<1x10xf32, #tpu.memory_space<vmem>>, %arg8: memref<16x10xf32, #tpu.memory_space<vmem>>) attributes {dimension_semantics = [#tpu.dimension_semantics<parallel>], iteration_bounds = array<i64: 1>, scalar_prefetch = 0 : i64, scratch_operands = 0 : i64, tpu.core_type = #tpu.core_type<tc>, window_params = [{transform_indices = @transform_0, window_bounds = array<i64: 16, 5>}, {pipeline_mode = #tpu.pipeline_mode<synchronous>, transform_indices = @transform_1, window_bounds = array<i64: 5, 128>}, {pipeline_mode = #tpu.pipeline_mode<synchronous>, transform_indices = @transform_2, window_bounds = array<i64: 1, 128>}, {pipeline_mode = #tpu.pipeline_mode<synchronous>, transform_indices = @transform_3, window_bounds = array<i64: 128, 128>}, {pipeline_mode = #tpu.pipeline_mode<synchronous>, transform_indices = @transform_4, window_bounds = array<i64: 1, 128>}, {pipeline_mode = #tpu.pipeline_mode<synchronous>, transform_indices = @transform_5, window_bounds = array<i64: 128, 10>}, {pipeline_mode = #tpu.pipeline_mode<synchronous>, transform_indices = @transform_6, window_bounds = array<i64: 1, 10>}, {transform_indices = @transform_7, window_bounds = array<i64: 16, 10>}]} {
    %c0 = arith.constant 0 : index
    %c0_0 = arith.constant 0 : index
    %0 = vector.load %arg1[%c0, %c0_0] : memref<16x5xf32, #tpu.memory_space<vmem>>, vector<16x5xf32>
    %1 = arith.truncf %0 : vector<16x5xf32> to vector<16x5xbf16>
    %c0_1 = arith.constant 0 : index
    %c0_2 = arith.constant 0 : index
    %2 = vector.load %arg2[%c0_1, %c0_2] : memref<5x128xbf16, #tpu.memory_space<vmem>>, vector<5x128xbf16>
    %cst = arith.constant dense<0.000000e+00> : vector<16x128xf32>
    %3 = tpu.matmul %1, %2, %cst {dimension_numbers = #tpu.dot_dimension_numbers<[1], [0], [0], [1], [0, 0, 1, 1], [], []>} : vector<16x5xbf16>, vector<5x128xbf16>, vector<16x128xf32> -> vector<16x128xf32>
    %c0_3 = arith.constant 0 : index
    %c0_4 = arith.constant 0 : index
    %4 = vector.load %arg3[%c0_3, %c0_4] : memref<1x128xf32, #tpu.memory_space<vmem>>, vector<1x128xf32>
    %5 = vector.broadcast %4 : vector<1x128xf32> to vector<16x128xf32>
    %6 = arith.addf %3, %5 : vector<16x128xf32>
    %cst_5 = arith.constant 0.000000e+00 : f32
    %7 = vector.broadcast %cst_5 : f32 to vector<16x128xf32>
    %8 = arith.maximumf %6, %7 : vector<16x128xf32>
    %9 = arith.truncf %8 : vector<16x128xf32> to vector<16x128xbf16>
    %c0_6 = arith.constant 0 : index
    %c0_7 = arith.constant 0 : index
    %10 = vector.load %arg4[%c0_6, %c0_7] : memref<128x128xbf16, #tpu.memory_space<vmem>>, vector<128x128xbf16>
    %cst_8 = arith.constant dense<0.000000e+00> : vector<16x128xf32>
    %11 = tpu.matmul %9, %10, %cst_8 {dimension_numbers = #tpu.dot_dimension_numbers<[1], [0], [0], [1], [0, 0, 1, 1], [], []>} : vector<16x128xbf16>, vector<128x128xbf16>, vector<16x128xf32> -> vector<16x128xf32>
    %c0_9 = arith.constant 0 : index
    %c0_10 = arith.constant 0 : index
    %12 = vector.load %arg5[%c0_9, %c0_10] : memref<1x128xf32, #tpu.memory_space<vmem>>, vector<1x128xf32>
    %13 = vector.broadcast %12 : vector<1x128xf32> to vector<16x128xf32>
    %14 = arith.addf %11, %13 : vector<16x128xf32>
    %cst_11 = arith.constant 0.000000e+00 : f32
    %15 = vector.broadcast %cst_11 : f32 to vector<16x128xf32>
    %16 = arith.maximumf %14, %15 : vector<16x128xf32>
    %17 = arith.truncf %16 : vector<16x128xf32> to vector<16x128xbf16>
    %c0_12 = arith.constant 0 : index
    %c0_13 = arith.constant 0 : index
    %18 = vector.load %arg6[%c0_12, %c0_13] : memref<128x10xbf16, #tpu.memory_space<vmem>>, vector<128x10xbf16>
    %cst_14 = arith.constant dense<0.000000e+00> : vector<16x10xf32>
    %19 = tpu.matmul %17, %18, %cst_14 {dimension_numbers = #tpu.dot_dimension_numbers<[1], [0], [0], [1], [0, 0, 1, 1], [], []>} : vector<16x128xbf16>, vector<128x10xbf16>, vector<16x10xf32> -> vector<16x10xf32>
    %c0_15 = arith.constant 0 : index
    %c0_16 = arith.constant 0 : index
    %20 = vector.load %arg7[%c0_15, %c0_16] : memref<1x10xf32, #tpu.memory_space<vmem>>, vector<1x10xf32>
    %21 = vector.broadcast %20 : vector<1x10xf32> to vector<16x10xf32>
    %22 = arith.addf %19, %21 : vector<16x10xf32>
    %c0_17 = arith.constant 0 : index
    %c0_18 = arith.constant 0 : index
    %23 = vector.load %arg8[%c0_17, %c0_18] : memref<16x10xf32, #tpu.memory_space<vmem>>, vector<16x10xf32>
    tpu.vector_store %arg8[%c0_17, %c0_18], %22 {strides = array<i32>} : memref<16x10xf32, #tpu.memory_space<vmem>>, vector<16x10xf32>,
    return
  }
  func.func @transform_0(%arg0: i32) -> (i32, i32) {
    %c0_i32 = arith.constant 0 : i32
    %c0_i32_0 = arith.constant 0 : i32
    return %arg0, %c0_i32 : i32, i32
  }
  func.func @transform_1(%arg0: i32) -> (i32, i32) {
    %c0_i32 = arith.constant 0 : i32
    %c0_i32_0 = arith.constant 0 : i32
    %c0_i32_1 = arith.constant 0 : i32
    return %c0_i32, %c0_i32_0 : i32, i32
  }
  func.func @transform_2(%arg0: i32) -> (i32, i32) {
    %c0_i32 = arith.constant 0 : i32
    %c0_i32_0 = arith.constant 0 : i32
    %c0_i32_1 = arith.constant 0 : i32
    return %c0_i32, %c0_i32_0 : i32, i32
  }
  func.func @transform_3(%arg0: i32) -> (i32, i32) {
    %c0_i32 = arith.constant 0 : i32
    %c0_i32_0 = arith.constant 0 : i32
    %c0_i32_1 = arith.constant 0 : i32
    return %c0_i32, %c0_i32_0 : i32, i32
  }
  func.func @transform_4(%arg0: i32) -> (i32, i32) {
    %c0_i32 = arith.constant 0 : i32
    %c0_i32_0 = arith.constant 0 : i32
    %c0_i32_1 = arith.constant 0 : i32
    return %c0_i32, %c0_i32_0 : i32, i32
  }
  func.func @transform_5(%arg0: i32) -> (i32, i32) {
    %c0_i32 = arith.constant 0 : i32
    %c0_i32_0 = arith.constant 0 : i32
    %c0_i32_1 = arith.constant 0 : i32
    return %c0_i32, %c0_i32_0 : i32, i32
  }
  func.func @transform_6(%arg0: i32) -> (i32, i32) {
    %c0_i32 = arith.constant 0 : i32
    %c0_i32_0 = arith.constant 0 : i32
    %c0_i32_1 = arith.constant 0 : i32
    return %c0_i32, %c0_i32_0 : i32, i32
  }
  func.func @transform_7(%arg0: i32) -> (i32, i32) {
    %c0_i32 = arith.constant 0 : i32
    %c0_i32_0 = arith.constant 0 : i32
    return %arg0, %c0_i32 : i32, i32
  }
}

</mosaic_0001>

<bundles_post_ra>
// kernel: mlp_forward.1
= control target key start
LH: loop header
LB: loop body
LE: loop exit
PB: predicated region body
PF: predicated region fallthrough
CT: control target
= control target key end

     0   :  { %vm42_vm0 = vcmask 1041408   ;;  %vm43_vm1 = vcmask 1042432   ;;  %v432_v0 = vmov 0.0   ;;  %v433_v2 = vmov 65535   ;;  %s567_s1 = inlined_call_operand.vmem [shape: bf16[5,128], index: 1, kind: input, shape index: {}]   ;;  %s568_s0 = inlined_call_operand.vmem [shape: f32[16,5], index: 0, kind: input, shape index: {}]   ;;  %s569_s3 = inlined_call_operand.vmem [shape: bf16[128,128], index: 3, kind: input, shape index: {}]   ;;  %s570_s5 = inlined_call_operand.vmem [shape: bf16[128,10], index: 5, kind: input, shape index: {}]   ;;  %s571_s2 = inlined_call_operand.vmem [shape: f32[1,128], index: 2, kind: input, shape index: {}]   ;;  %s572_s4 = inlined_call_operand.vmem [shape: f32[1,128], index: 4, kind: input, shape index: {}]   ;;  %s573_s6 = inlined_call_operand.vmem [shape: f32[1,10], index: 6, kind: input, shape index: {}]   ;;  %s574_s7 = inlined_call_operand.vmem [shape: f32[16,10], index: 7, kind: output, shape index: {}]  }
   0x1   :  { %367 = vmatprep.subr.bf16.mxu0 %v432_v0  ;;  %v30_v1 = vld [vmem:[%s567_s1] sm:$0x7]  ;;  %v44_v3 = vsel %vm42_vm0, 4294967295, %v433_v2  ;;  %v28_v5 = vld [vmem:[%s568_s0 + $0x8] sm:$0xff]  ;;  %373 = vmatprep.subr.bf16.mxu1 %v432_v0  ;;  %vm434_vm2 = vmmov 0   ;;  %vm38_vm3 = vcmask 39936  }
   0x2   :  { %v27_v4 = vld [vmem:[%s568_s0] sm:$0xff]  ;;  %v45_v6 = vsel %vm43_vm1, %v44_v3, 0  ;;  %369 = vmatprep.mubr.msk.bf16.mxu0 %vm434_vm2, %v432_v0  ;;  %389 = vmatprep.mubr.msk.bf16.mxu1 %vm434_vm2, %v432_v0  ;;  %v417_v10 = vld [vmem:[%s569_s3 + $0x8] sm:$0xff]   ;;  %v418_v11 = vld [vmem:[%s569_s3 + $0x10] sm:$0xff]   ;;  %vm320_vm4 = vcmask 80896  }
   0x3   :  { %v47_v7 = vand.u32 %v45_v6, %v30_v1  ;;  %v416_v8 = vld [vmem:[%s569_s3] sm:$0xff]   ;;  %v29_v9 = vpack.c.bf16 %v28_v5, %v27_v4  ;;  %v419_v12 = vld [vmem:[%s569_s3 + $0x18] sm:$0xff]   ;;  %v421_v14 = vld [vmem:[%s569_s3 + $0x28] sm:$0xff]  }
   0x4   :  { %374 = vmatpush3.bf16.msra.mxu1 %v416_v8  ;;  %v420_v13 = vld [vmem:[%s569_s3 + $0x20] sm:$0xff]   ;;  %v422_v15 = vld [vmem:[%s569_s3 + $0x30] sm:$0xff]   ;;  %v423_v16 = vld [vmem:[%s569_s3 + $0x38] sm:$0xff]  }
   0x5   :  { %368 = vmatpush3.bf16.msra.mxu0 %v47_v7  ;;  %375 = vmatprep.subr.bf16.mxu1 %v432_v0  ;;  %v424_v17 = vld [vmem:[%s570_s5] sm:$0xff]   ;;  %v425_v18 = vld [vmem:[%s570_s5 + $0x8] sm:$0xff]   ;;  %v426_v19 = vld [vmem:[%s570_s5 + $0x10] sm:$0xff]  }
   0x6   :  { %393 = vmatprep.subr.bf16.mxu0 %v432_v0  ;;  %v427_v20 = vld [vmem:[%s570_s5 + $0x18] sm:$0xff]   ;;  %v428_v21 = vld [vmem:[%s570_s5 + $0x20] sm:$0xff]   ;;  %v429_v22 = vld [vmem:[%s570_s5 + $0x28] sm:$0xff]  }
   0x7   :  { %v327_v23 = vld [vmem:[%s571_s2] ss:$0 sm:$0xff]  ;;  %v430_v33 = vld [vmem:[%s570_s5 + $0x30] sm:$0xff]   ;;  %v431_v34 = vld [vmem:[%s570_s5 + $0x38] sm:$0xff]  }
   0x8   :  { %370 = vmatmul.mubr.msk.bf16.vlgmr.msra.gmra.mrb[0].mxu0 %vm38_vm3, %v29_v9  ;;  %376 = vmatpush3.bf16.msra.mxu1 %v417_v10  ;;  %v329_v35 = vld [vmem:[%s572_s4] ss:$0 sm:$0xff] }
   0x9   :  { %409 = vmatprep.mubr.msk.bf16.mxu0 %vm434_vm2, %v432_v0  ;;  %377 = vmatprep.subr.bf16.mxu1 %v432_v0  ;;  %v338_v45 = vld [vmem:[%s573_s6] ss:$0 sm:$0xff] }
   0xa   :  { %394 = vmatpush3.bf16.msra.mxu0 %v424_v17 }
   0xb   :  { %395 = vmatprep.subr.bf16.mxu0 %v432_v0 }
   0xc   :  { %378 = vmatpush3.bf16.msra.mxu1 %v418_v11 }
   0xd   :  { %379 = vmatprep.subr.bf16.mxu1 %v432_v0 }
   0xe   :  { %396 = vmatpush3.bf16.msra.mxu0 %v425_v18 }
   0xf   :  { %397 = vmatprep.subr.bf16.mxu0 %v432_v0 }
  0x10   :  { %380 = vmatpush3.bf16.msra.mxu1 %v419_v12 }
  0x11   :  { %381 = vmatprep.subr.bf16.mxu1 %v432_v0 }
  0x12   :  { %398 = vmatpush3.bf16.msra.mxu0 %v426_v19 }
  0x13   :  { %399 = vmatprep.subr.bf16.mxu0 %v432_v0 }
  0x14   :  { %382 = vmatpush3.bf16.msra.mxu1 %v420_v13 }
  0x15   :  { %383 = vmatprep.subr.bf16.mxu1 %v432_v0 }
  0x16   :  { %400 = vmatpush3.bf16.msra.mxu0 %v427_v20 }
  0x17   :  { %401 = vmatprep.subr.bf16.mxu0 %v432_v0 }
  0x18   :  { %384 = vmatpush3.bf16.msra.mxu1 %v421_v14 }
  0x19   :  { %385 = vmatprep.subr.bf16.mxu1 %v432_v0 }
  0x1a   :  { %402 = vmatpush3.bf16.msra.mxu0 %v428_v21 }
  0x1b   :  { %403 = vmatprep.subr.bf16.mxu0 %v432_v0 }
  0x1c   :  { %386 = vmatpush3.bf16.msra.mxu1 %v422_v15 }
  0x1d   :  { %387 = vmatprep.subr.bf16.mxu1 %v432_v0 }
  0x1e   :  { %404 = vmatpush3.bf16.msra.mxu0 %v429_v22 }
  0x1f   :  { %405 = vmatprep.subr.bf16.mxu0 %v432_v0 }
  0x20   :  { %388 = vmatpush3.bf16.msra.mxu1 %v423_v16 }
  0x22   :  { %406 = vmatpush3.bf16.msra.mxu0 %v430_v33 }
  0x23   :  { %407 = vmatprep.subr.bf16.mxu0 %v432_v0 }
  0x26   :  { %408 = vmatpush3.bf16.msra.mxu0 %v431_v34 }
  0xdb   :  { %v83_v24 = vpop.f32.mrb[0].mxu0 }
  0xdc   :  { %v84_v25 = vadd.f32 %v327_v23, %v83_v24  ;;  %v371_v26 = vpop.f32.mrb[1].mxu0 }
  0xdd   :  { %v86_v27 = vpop.f32.mrb[2].mxu0 }
  0xde   :  { %v87_v28 = vadd.f32 %v327_v23, %v86_v27  ;;  %v372_v29 = vpop.f32.mrb[3].mxu0  ;;  %v90_v30 = vmax.f32 %v84_v25, 0.0 }
  0xe0   :  { %v91_v31 = vmax.f32 %v87_v28, 0.0 }
  0xe2   :  { %v92_v32 = vpack.c.bf16 %v91_v31, %v90_v30 }
  0xe4   :  { %390 = vmatmul.mubr.bf16.vlgmr.msra.gmra.mrb[0].mxu1 %v92_v32 }
 0x1b7   :  { %v198_v36 = vpop.f32.mrb[0].mxu1 }
 0x1b8   :  { %v199_v37 = vadd.f32 %v329_v35, %v198_v36  ;;  %v391_v38 = vpop.f32.mrb[1].mxu1 }
 0x1b9   :  { %v201_v39 = vpop.f32.mrb[2].mxu1 }
 0x1ba   :  { %v202_v40 = vadd.f32 %v329_v35, %v201_v39  ;;  %v392_v41 = vpop.f32.mrb[3].mxu1  ;;  %v205_v42 = vmax.f32 %v199_v37, 0.0 }
 0x1bc   :  { %v206_v43 = vmax.f32 %v202_v40, 0.0 }
 0x1be   :  { %v207_v44 = vpack.c.bf16 %v206_v43, %v205_v42 }
 0x1c0   :  { %410 = vmatmul.mubr.bf16.vlgmr.msra.gmra.mrb[4].mxu0 %v207_v44 }
 0x293   :  { %v313_v46 = vpop.f32.mrb[4].mxu0 }
 0x294   :  { %v314_v47 = vadd.f32 %v338_v45, %v313_v46  ;;  %v411_v48 = vpop.f32.mrb[5].mxu0 }
 0x295   :  { %v316_v49 = vpop.f32.mrb[6].mxu0 }
 0x296   :  { %321 = vst.msk [vmem:[%s574_s7] sm:$0xff] %vm320_vm4, %v314_v47  ;;  %v317_v50 = vadd.f32 %v338_v45, %v316_v49  ;;  %v412_v51 = vpop.f32.mrb[7].mxu0 }
 0x298   :  { %322 = vst.msk [vmem:[%s574_s7 + $0x8] sm:$0xff] %vm320_vm4, %v317_v50 }

</bundles_post_ra>
